<compile_context>
chip_gen: v5e
topology: v5e:2x2
jax: 0.10.0
libtpu: 0.0.40
codegen_flags: <defaults>
</compile_context>

<pallas_src>
import math

import jax
import jax.numpy as jnp
from jax.experimental import pallas as pl
from jax.experimental.pallas import tpu as pltpu


_SQRT_2_OVER_PI = 0.7978845608028654
_GELU_COEFF = 0.044715


def _gelu_tanh(x):
    # Matches PyTorch nn.GELU(approximate='tanh'); computed in f32 (VPU + EUP).
    return 0.5 * x * (1.0 + jnp.tanh(_SQRT_2_OVER_PI * (x + _GELU_COEFF * x * x * x)))


# --------------------------------------------------------------------------- #
# Kernels
# --------------------------------------------------------------------------- #
def _mlp_kernel(x_ref, w1_ref, b1_ref, w2_ref, b2_ref, o_ref, acc_ref):
    """One (row-tile, hidden-tile) grid step of the fused MLP (with bias)."""
    h_idx = pl.program_id(1)

    @pl.when(h_idx == 0)
    def _init():
        # Fold the projection bias into the accumulator init (saves a separate
        # (TR, D) add + branch at finalize time).
        acc_ref[...] = jnp.broadcast_to(
            b2_ref[...].astype(jnp.float32), acc_ref.shape)

    # Native-dtype MXU matmul, f32 accumulation.
    h = jnp.dot(x_ref[...], w1_ref[...], preferred_element_type=jnp.float32)
    h = _gelu_tanh(h + b1_ref[...].astype(jnp.float32))
    acc_ref[...] += jnp.dot(h.astype(w2_ref.dtype), w2_ref[...],
                            preferred_element_type=jnp.float32)

    @pl.when(h_idx == pl.num_programs(1) - 1)
    def _finalize():
        o_ref[...] = acc_ref[...].astype(o_ref.dtype)


def _mlp_kernel_nobias(x_ref, w1_ref, w2_ref, o_ref, acc_ref):
    """Bias-free variant (no zero-bias DMAs, no VPU adds)."""
    h_idx = pl.program_id(1)

    @pl.when(h_idx == 0)
    def _init():
        acc_ref[...] = jnp.zeros_like(acc_ref)

    h = jnp.dot(x_ref[...], w1_ref[...], preferred_element_type=jnp.float32)
    h = _gelu_tanh(h)
    acc_ref[...] += jnp.dot(h.astype(w2_ref.dtype), w2_ref[...],
                            preferred_element_type=jnp.float32)

    @pl.when(h_idx == pl.num_programs(1) - 1)
    def _finalize():
        o_ref[...] = acc_ref[...].astype(o_ref.dtype)


# --------------------------------------------------------------------------- #
# Parameter setup (one-time) and tile / VMEM planning
# --------------------------------------------------------------------------- #
def prepare_mlp_params(w_fc, b_fc, w_proj, b_proj, dtype=None):
    """One-time parameter setup: cast to the compute dtype and pre-transpose the
    PyTorch-layout weights so the kernel does plain `x @ W` (avoids paying an
    HBM-level transpose on every forward call)."""
    if dtype is None:
        dtype = w_fc.dtype
    w1 = jnp.asarray(w_fc, dtype).T        # (D, H)
    w2 = jnp.asarray(w_proj, dtype).T      # (H, D)
    b1 = None if b_fc is None else jnp.asarray(b_fc, dtype)
    b2 = None if b_proj is None else jnp.asarray(b_proj, dtype)
    return w1, b1, w2, b2


def _vmem_limit_bytes():
    # Per-generation scoped-VMEM budget: leave ~25% headroom vs physical VMEM
    # (128 MiB on v5e/v6e, 64 MiB per TensorCore on v7x), capped at 100 MiB.
    try:
        cap = int(pltpu.get_tpu_info().vmem_capacity_bytes)
    except Exception:
        cap = 64 * 1024 * 1024            # conservative: assume v7x-sized VMEM
    return min((cap * 3) // 4, 100 * 1024 * 1024)


def _round_up(x, m):
    return ((x + m - 1) // m) * m


def _tile_footprint_bytes(tr, th, d, itemsize):
    # Double-buffered pipelined blocks (x, out, w1, w2, biases) + f32 scratch
    # accumulator + the transient (TR, TH) f32 hidden block.
    dbl = 2
    io = dbl * 2 * tr * d * itemsize
    weights = dbl * (2 * d * th + th + d) * itemsize
    acc = tr * d * 4
    hidden = tr * th * 4
    return io + weights + acc + hidden


def _pick_tiles(rows, d, hdim, itemsize, block_rows, block_hidden, budget):
    # Hidden-tile candidates: multiples of 128 that divide H exactly (a ragged
    # hidden block would feed garbage weight columns into the accumulator), or
    # the full H as a fallback.
    th_cands = [c for c in range(128, min(block_hidden, hdim) + 1, 128)
                if hdim % c == 0]
    th_cands = sorted(th_cands, reverse=True) or [hdim]

    # Row tile: multiple of 8 sublanes (ideally 256 to feed full-height MXU
    # tiles on v6e/v7x); shrink for small inputs so the "parallel" row axis has
    # at least two tiles for v7x's two TensorCores.
    tr = max(8, (min(block_rows, _round_up(rows, 8)) // 8) * 8)
    if rows >= 16 and pl.cdiv(rows, tr) < 2:
        tr = _round_up(pl.cdiv(rows, 2), 8)

    ti = 0
    th = th_cands[ti]
    while _tile_footprint_bytes(tr, th, d, itemsize) > budget:
        if ti + 1 < len(th_cands):
            ti += 1
            th = th_cands[ti]
        elif tr > 8:
            tr = max(8, ((tr // 2) // 8) * 8)
        else:
            break
    return tr, th


# --------------------------------------------------------------------------- #
# Forward
# --------------------------------------------------------------------------- #
def mlp_forward(x, w1, b1, w2, b2, *, dropout_p=0.0,
                block_rows=256, block_hidden=2048):
    """Pallas equivalent of _MLP.forward (eval mode).

    Args:
      x:  (..., D) input.
      w1: (D, H) pre-transposed c_fc weight   (see prepare_mlp_params).
      b1: (H,) or None.
      w2: (H, D) pre-transposed c_proj weight (see prepare_mlp_params).
      b2: (D,) or None.

    Numerics: matmuls run in the operands' native dtype with f32 accumulation
    (full MXU rate).  Callers needing f32-faithful results can pass f32
    operands under `jax.default_matmul_precision('highest')`.
    """
    orig_shape = x.shape
    d = int(orig_shape[-1])
    hdim = int(w1.shape[1])
    assert w1.shape == (d, hdim) and w2.shape == (hdim, d), (
        "pass pre-transposed weights: w1=(D,H), w2=(H,D) (see prepare_mlp_params)")

    rows = 1
    for s in orig_shape[:-1]:
        rows *= int(s)
    x2 = x.reshape(rows, d)

    vmem_limit = _vmem_limit_bytes()
    itemsize = max(jnp.dtype(x.dtype).itemsize, jnp.dtype(w1.dtype).itemsize)
    tr, th = _pick_tiles(rows, d, hdim, itemsize, block_rows, block_hidden,
                         budget=(vmem_limit * 4) // 5)
    footprint = _tile_footprint_bytes(tr, th, d, itemsize)
    assert footprint <= vmem_limit, (
        f"MLP tile footprint {footprint} B exceeds VMEM limit {vmem_limit} B")

    grid = (pl.cdiv(rows, tr), hdim // th)

    x_spec = pl.BlockSpec((tr, d), lambda i, h: (i, 0))
    o_spec = pl.BlockSpec((tr, d), lambda i, h: (i, 0))
    w1_spec = pl.BlockSpec((d, th), lambda i, h: (0, h))
    w2_spec = pl.BlockSpec((th, d), lambda i, h: (h, 0))

    cparams = pltpu.CompilerParams(
        dimension_semantics=("parallel", "arbitrary"),
        vmem_limit_bytes=int(vmem_limit),
    )
    xbytes = jnp.dtype(x.dtype).itemsize
    wbytes = jnp.dtype(w1.dtype).itemsize
    cost = pl.CostEstimate(
        flops=4 * rows * d * hdim,
        transcendentals=rows * hdim,
        bytes_accessed=2 * rows * d * xbytes + (2 * d * hdim + hdim + d) * wbytes,
    )
    scratch = [pltpu.VMEM((tr, d), jnp.float32)]

    if b1 is not None and b2 is not None:
        out = pl.pallas_call(
            _mlp_kernel,
            out_shape=jax.ShapeDtypeStruct((rows, d), x.dtype),
            grid=grid,
            in_specs=[x_spec,
                      w1_spec,
                      pl.BlockSpec((1, th), lambda i, h: (0, h)),
                      w2_spec,
                      pl.BlockSpec((1, d), lambda i, h: (0, 0))],
            out_specs=o_spec,
            scratch_shapes=scratch,
            compiler_params=cparams,
            cost_estimate=cost,
        )(x2, w1, b1.reshape(1, hdim), w2, b2.reshape(1, d))
    else:
        assert b1 is None and b2 is None, "bias must be all-or-none (PyTorch `bias`)"
        out = pl.pallas_call(
            _mlp_kernel_nobias,
            out_shape=jax.ShapeDtypeStruct((rows, d), x.dtype),
            grid=grid,
            in_specs=[x_spec, w1_spec, w2_spec],
            out_specs=o_spec,
            scratch_shapes=scratch,
            compiler_params=cparams,
            cost_estimate=cost,
        )(x2, w1, w2)

    # TODO(synk): training-mode dropout (pltpu.prng_seed + stateful_bernoulli
    # mask) not implemented; nn.Dropout is the identity in eval mode, which is
    # what this forward computes.
    del dropout_p

    return out.reshape(orig_shape)


# --------------------------------------------------------------------------- #
# Demo / self-check
# --------------------------------------------------------------------------- #
if __name__ == "__main__":
    # Module config implied by the forward: n_embd, ff_mult, bias=True, dropout.
    n_embd = 128
    ff_mult = 4
    hidden = ff_mult * n_embd
    B, T = 2, 96                    # rows = 192 -> 2 row tiles x 2 hidden tiles

    key = jax.random.PRNGKey(0)
    kx, k1, k2, k3, k4 = jax.random.split(key, 5)

    # PyTorch nn.Linear default init: U(-1/sqrt(fan_in), 1/sqrt(fan_in)).
    lim1 = 1.0 / math.sqrt(n_embd)
    lim2 = 1.0 / math.sqrt(hidden)
    w_fc = jax.random.uniform(k1, (hidden, n_embd), jnp.float32, -lim1, lim1)
    b_fc = jax.random.uniform(k2, (hidden,), jnp.float32, -lim1, lim1)
    w_proj = jax.random.uniform(k3, (n_embd, hidden), jnp.float32, -lim2, lim2)
    b_proj = jax.random.uniform(k4, (n_embd,), jnp.float32, -lim2, lim2)
    x = jax.random.normal(kx, (B, T, n_embd), jnp.float32)

    # One-time parameter setup: bf16 compute dtype + pre-transposed layouts.
    compute_dtype = jnp.bfloat16
    w1, b1, w2, b2 = prepare_mlp_params(w_fc, b_fc, w_proj, b_proj,
                                        dtype=compute_dtype)
    xb = x.astype(compute_dtype)

    y = mlp_forward(xb, w1, b1, w2, b2, dropout_p=0.0,
                    block_rows=256, block_hidden=256)
    y = jax.block_until_ready(y)

    # Pure-JAX f32 reference computed from the SAME bf16-rounded params/input,
    # so the only difference is the kernel's bf16 MXU math + bf16 output cast.
    xf = xb.astype(jnp.float32).reshape(-1, n_embd)
    h_ref = jnp.dot(xf, w1.astype(jnp.float32),
                    precision=jax.lax.Precision.HIGHEST) + b1.astype(jnp.float32)
    h_ref = _gelu_tanh(h_ref)
    ref = jnp.dot(h_ref, w2.astype(jnp.float32),
                  precision=jax.lax.Precision.HIGHEST) + b2.astype(jnp.float32)
    ref = ref.reshape(B, T, n_embd)

    err = float(jnp.max(jnp.abs(y.astype(jnp.float32) - ref)))
    # bf16 operands + bf16 output cast -> ~1e-2 relative numerics.
    assert err < 1e-1, f"mismatch vs reference: max abs err {err}"
    print("KERNEL_OK")
</pallas_src>

<mosaic_0001>
module attributes {stable_mosaic.version = 11 : i64} {
  func.func @_mlp_kernel(%arg0: i32, %arg1: i32, %arg2: memref<96x128xbf16, #tpu.memory_space<vmem>>, %arg3: memref<128x256xbf16, #tpu.memory_space<vmem>>, %arg4: memref<1x256xbf16, #tpu.memory_space<vmem>>, %arg5: memref<256x128xbf16, #tpu.memory_space<vmem>>, %arg6: memref<1x128xbf16, #tpu.memory_space<vmem>>, %arg7: memref<96x128xbf16, #tpu.memory_space<vmem>>, %arg8: memref<96x128xf32, #tpu.memory_space<vmem>>) attributes {dimension_semantics = [#tpu.dimension_semantics<parallel>, #tpu.dimension_semantics<arbitrary>], iteration_bounds = array<i64: 2, 2>, scalar_prefetch = 0 : i64, scratch_operands = 1 : i64, tpu.core_type = #tpu.core_type<tc>, window_params = [{transform_indices = @transform_0, window_bounds = array<i64: 96, 128>}, {transform_indices = @transform_1, window_bounds = array<i64: 128, 256>}, {transform_indices = @transform_2, window_bounds = array<i64: 1, 256>}, {transform_indices = @transform_3, window_bounds = array<i64: 256, 128>}, {pipeline_mode = #tpu.pipeline_mode<synchronous>, transform_indices = @transform_4, window_bounds = array<i64: 1, 128>}, {transform_indices = @transform_5, window_bounds = array<i64: 96, 128>}]} {
    %c0_i32 = arith.constant 0 : i32
    %0 = arith.cmpi eq, %arg1, %c0_i32 : i32
    %1 = arith.extui %0 : i1 to i32
    %c0_i32_0 = arith.constant 0 : i32
    %2 = arith.cmpi ne, %1, %c0_i32_0 : i32
    scf.if %2 {
      %c0_18 = arith.constant 0 : index
      %c0_19 = arith.constant 0 : index
      %32 = vector.load %arg6[%c0_18, %c0_19] : memref<1x128xbf16, #tpu.memory_space<vmem>>, vector<1x128xbf16>
      %33 = arith.extf %32 : vector<1x128xbf16> to vector<1x128xf32>
      %34 = vector.shape_cast %33 : vector<1x128xf32> to vector<1x128xf32>
      %35 = vector.broadcast %34 : vector<1x128xf32> to vector<96x128xf32>
      %c0_20 = arith.constant 0 : index
      %c0_21 = arith.constant 0 : index
      %36 = vector.load %arg8[%c0_20, %c0_21] : memref<96x128xf32, #tpu.memory_space<vmem>>, vector<96x128xf32>
      tpu.vector_store %arg8[%c0_20, %c0_21], %35 {strides = array<i32>} : memref<96x128xf32, #tpu.memory_space<vmem>>, vector<96x128xf32>,
    } else {
    }
    %c0 = arith.constant 0 : index
    %c0_1 = arith.constant 0 : index
    %3 = vector.load %arg2[%c0, %c0_1] : memref<96x128xbf16, #tpu.memory_space<vmem>>, vector<96x128xbf16>
    %c0_2 = arith.constant 0 : index
    %c0_3 = arith.constant 0 : index
    %4 = vector.load %arg3[%c0_2, %c0_3] : memref<128x256xbf16, #tpu.memory_space<vmem>>, vector<128x256xbf16>
    %cst = arith.constant dense<0.000000e+00> : vector<96x256xf32>
    %5 = tpu.matmul %3, %4, %cst {dimension_numbers = #tpu.dot_dimension_numbers<[1], [0], [0], [1], [0, 0, 1, 1], [], []>} : vector<96x128xbf16>, vector<128x256xbf16>, vector<96x256xf32> -> vector<96x256xf32>
    %c0_4 = arith.constant 0 : index
    %c0_5 = arith.constant 0 : index
    %6 = vector.load %arg4[%c0_4, %c0_5] : memref<1x256xbf16, #tpu.memory_space<vmem>>, vector<1x256xbf16>
    %7 = arith.extf %6 : vector<1x256xbf16> to vector<1x256xf32>
    %8 = vector.broadcast %7 : vector<1x256xf32> to vector<96x256xf32>
    %9 = arith.addf %5, %8 : vector<96x256xf32>
    %cst_6 = arith.constant 5.000000e-01 : f32
    %10 = vector.broadcast %cst_6 : f32 to vector<96x256xf32>
    %11 = arith.mulf %10, %9 : vector<96x256xf32>
    %cst_7 = arith.constant 4.471500e-02 : f32
    %12 = vector.broadcast %cst_7 : f32 to vector<96x256xf32>
    %13 = arith.mulf %12, %9 : vector<96x256xf32>
    %14 = arith.mulf %13, %9 : vector<96x256xf32>
    %15 = arith.mulf %14, %9 : vector<96x256xf32>
    %16 = arith.addf %9, %15 : vector<96x256xf32>
    %cst_8 = arith.constant 0.797884583 : f32
    %17 = vector.broadcast %cst_8 : f32 to vector<96x256xf32>
    %18 = arith.mulf %17, %16 : vector<96x256xf32>
    %19 = math.tanh %18 : vector<96x256xf32>
    %cst_9 = arith.constant 1.000000e+00 : f32
    %20 = vector.broadcast %cst_9 : f32 to vector<96x256xf32>
    %21 = arith.addf %20, %19 : vector<96x256xf32>
    %22 = arith.mulf %11, %21 : vector<96x256xf32>
    %c0_10 = arith.constant 0 : index
    %c0_11 = arith.constant 0 : index
    %23 = vector.load %arg8[%c0_10, %c0_11] : memref<96x128xf32, #tpu.memory_space<vmem>>, vector<96x128xf32>
    %24 = arith.truncf %22 : vector<96x256xf32> to vector<96x256xbf16>
    %c0_12 = arith.constant 0 : index
    %c0_13 = arith.constant 0 : index
    %25 = vector.load %arg5[%c0_12, %c0_13] : memref<256x128xbf16, #tpu.memory_space<vmem>>, vector<256x128xbf16>
    %cst_14 = arith.constant dense<0.000000e+00> : vector<96x128xf32>
    %26 = tpu.matmul %24, %25, %cst_14 {dimension_numbers = #tpu.dot_dimension_numbers<[1], [0], [0], [1], [0, 0, 1, 1], [], []>} : vector<96x256xbf16>, vector<256x128xbf16>, vector<96x128xf32> -> vector<96x128xf32>
    %27 = arith.addf %23, %26 : vector<96x128xf32>
    %c0_15 = arith.constant 0 : index
    %c0_16 = arith.constant 0 : index
    %28 = vector.load %arg8[%c0_15, %c0_16] : memref<96x128xf32, #tpu.memory_space<vmem>>, vector<96x128xf32>
    tpu.vector_store %arg8[%c0_15, %c0_16], %27 {strides = array<i32>} : memref<96x128xf32, #tpu.memory_space<vmem>>, vector<96x128xf32>,
    %c1_i32 = arith.constant 1 : i32
    %29 = arith.cmpi eq, %arg1, %c1_i32 : i32
    %30 = arith.extui %29 : i1 to i32
    %c0_i32_17 = arith.constant 0 : i32
    %31 = arith.cmpi ne, %30, %c0_i32_17 : i32
    scf.if %31 {
      %c0_18 = arith.constant 0 : index
      %c0_19 = arith.constant 0 : index
      %32 = vector.load %arg8[%c0_18, %c0_19] : memref<96x128xf32, #tpu.memory_space<vmem>>, vector<96x128xf32>
      %33 = arith.truncf %32 : vector<96x128xf32> to vector<96x128xbf16>
      %c0_20 = arith.constant 0 : index
      %c0_21 = arith.constant 0 : index
      %34 = vector.load %arg7[%c0_20, %c0_21] : memref<96x128xbf16, #tpu.memory_space<vmem>>, vector<96x128xbf16>
      tpu.vector_store %arg7[%c0_20, %c0_21], %33 {strides = array<i32>} : memref<96x128xbf16, #tpu.memory_space<vmem>>, vector<96x128xbf16>,
    } else {
    }
    return
  }
  func.func @transform_0(%arg0: i32, %arg1: i32) -> (i32, i32) {
    %c0_i32 = arith.constant 0 : i32
    %c0_i32_0 = arith.constant 0 : i32
    return %arg0, %c0_i32 : i32, i32
  }
  func.func @transform_1(%arg0: i32, %arg1: i32) -> (i32, i32) {
    %c0_i32 = arith.constant 0 : i32
    %c0_i32_0 = arith.constant 0 : i32
    return %c0_i32, %arg1 : i32, i32
  }
  func.func @transform_2(%arg0: i32, %arg1: i32) -> (i32, i32) {
    %c0_i32 = arith.constant 0 : i32
    %c0_i32_0 = arith.constant 0 : i32
    return %c0_i32, %arg1 : i32, i32
  }
  func.func @transform_3(%arg0: i32, %arg1: i32) -> (i32, i32) {
    %c0_i32 = arith.constant 0 : i32
    %c0_i32_0 = arith.constant 0 : i32
    return %arg1, %c0_i32 : i32, i32
  }
  func.func @transform_4(%arg0: i32, %arg1: i32) -> (i32, i32) {
    %c0_i32 = arith.constant 0 : i32
    %c0_i32_0 = arith.constant 0 : i32
    %c0_i32_1 = arith.constant 0 : i32
    return %c0_i32, %c0_i32_0 : i32, i32
  }
  func.func @transform_5(%arg0: i32, %arg1: i32) -> (i32, i32) {
    %c0_i32 = arith.constant 0 : i32
    %c0_i32_0 = arith.constant 0 : i32
    return %arg0, %c0_i32 : i32, i32
  }
}

</mosaic_0001>

<bundles_post_ra>
// kernel: tpu_custom_call.1
= control target key start
LH: loop header
LB: loop body
LE: loop exit
PB: predicated region body
PF: predicated region fallthrough
CT: control target
= control target key end

     0   :  { %s2511_s0 = inlined_call_operand.hbm [shape: bf16[192,128], index: 0, kind: input, shape index: {}]   ;;  %s2512_s1 = inlined_call_operand.hbm [shape: bf16[128,512], index: 1, kind: input, shape index: {}]   ;;  %s2513_s2 = inlined_call_operand.hbm [shape: bf16[1,512], index: 2, kind: input, shape index: {}]   ;;  %s2514_s3 = inlined_call_operand.hbm [shape: bf16[512,128], index: 3, kind: input, shape index: {}]   ;;  %s2515_s4 = inlined_call_operand.vmem [shape: bf16[1,128], index: 4, kind: input, shape index: {}]   ;;  %s2516_s5 = inlined_call_operand.hbm [shape: bf16[192,128], index: 5, kind: output, shape index: {}]  }
   0x1   :  { %2531 = sst [smem:[#allocation28_spill]] %s2511_s0 }
   0x2   :  { %2532 = sst [smem:[#allocation29_spill]] %s2512_s1 }
   0x3   :  { %2533 = sst [smem:[#allocation30_spill]] %s2515_s4 }
   0x4   :  { %2534 = sst [smem:[#allocation31_spill]] %s2516_s5 }
   0x5   :  { %10 = vsyncpa [#allocation4], 0 }
   0x6   :  { %12 = vsyncpa [#allocation4 + $0x1], 0 }
   0x7   :  { %13 = vsyncpa [#allocation7], 0 }
   0x8   :  { %15 = vsyncpa [#allocation7 + $0x1], 0 }
   0x9   :  { %16 = vsyncpa [#allocation10], 0 }
   0xa   :  { %18 = vsyncpa [#allocation10 + $0x1], 0 }
   0xb   :  { %19 = vsyncpa [#allocation5], 0 }
   0xc   :  { %21 = vsyncpa [#allocation5 + $0x1], 0  ;;  %s2022_s18 = smov 0   ;;  %s2024_s19 = smov 0  }
   0xd   :  { %s2026_s20 = smov 0   ;;  %s2028_s21 = smov 0  }
   0xe   :  { %s2030_s22 = smov 0   ;;  %s2032_s23 = smov 0  }
   0xf   :  { %s2034_s24 = smov 0   ;;  %s2036_s25 = smov 0  }
  0x10   :  { %s2038_s26 = smov 0   ;;  %s2040_s27 = smov 0  }
  0x11   :  { %s2042_s28 = smov 0  }
  0x12 LB: > { %2535 = sst [smem:[#allocation16_spill]] %s1951_s20  ;;  %p54_p0 = scmp.eq.s32.totalorder %s1983_s28, 0  ;;  %s1983_s28 = sphi %s2042_s28, %s27_s28   ;;  %s1979_s27 = sphi %s2040_s27, %s2571_s27   ;;  %s1975_s26 = sphi %s2038_s26, %s2577_s26   ;;  %s1971_s25 = sphi %s2036_s25, %s2569_s25   ;;  %s1967_s24 = sphi %s2034_s24, %s2576_s24   ;;  %s1963_s23 = sphi %s2032_s23, %s2568_s23   ;;  %s1959_s22 = sphi %s2030_s22, %s2575_s22   ;;  %s1955_s21 = sphi %s2028_s21, %s2574_s21   ;;  %s1951_s20 = sphi %s2026_s20, %s2566_s20   ;;  %s1947_s19 = sphi %s2024_s19, %s2573_s19   ;;  %s1943_s18 = sphi %s2022_s18, %s2572_s18  }
  0x13   : > { %2536 = sst [smem:[#allocation17_spill]] %s1955_s21  ;;  %s72_s29 = sadd.s32 1, %s1951_s20 }
  0x14   : > { %2537 = sst [smem:[#allocation18_spill]] %s1963_s23  ;;  %p79_p1 = scmp.ne.s32.totalorder %s1951_s20, %s1947_s19 }
  0x15   : > { %2538 = sst [smem:[#allocation19_spill]] %s1971_s25  ;;  %p85_p2 = scmp.ne.s32.totalorder %s1947_s19, %s1943_s18 }
  0x16   : > { %2539 = sst [smem:[#allocation20_spill]] %s1979_s27  ;;  %p2519_p3 = scmp.lt.s32.totalorder %s1983_s28, 4 }
  0x17   : > { %2540 = sst [smem:[#allocation21_spill]] %s1983_s28  ;;  %p81_p4 = por %p79_p1, %p54_p0 }
  0x18   : > { %s233_s30 = sand.u32 1, %s1983_s28   ;;  %s2088_s6 = sand.u32 1, %s1951_s20  }
  0x19   : > { %s2517_s7 = sshll.u32 %s2088_s6, 7  ;;  %s1483_s8 = sshll.u32 %s1975_s26, 3 }
  0x1a   : > { %s2541_s1 = sld [smem:[#allocation29_spill]]  ;;  %s237_s13 = scalar_lea.vmem [#allocation6], %s2517_s7 }
  0x1b   : > { %s245_s14 = sshll.u32 %s237_s13, 4  ;;  %p2099_p5 = pnand %p2519_p3, %p81_p4  ;;  %s246_s14 = int_to_ptr.vmem [resolvable:$true] %s245_s14 }
  0x1c   : > { %p1321_p6 = scmp.ge.s32.totalorder %s1983_s28, 1  ;;  %s2104_s16 = scalar_lea.sflag [#allocation7], %s233_s30 }
  0x1d   : > { %s1985_s17 = smov 256   ;;  %s1987_s9 = smov 8  }
  0x1e   : > { %p294_p7 = scmp.lt.s32.totalorder %s1983_s28, 5  ;;  %s2115_s30 = sadd.s32 4294967295, %s1983_s28  }
  0x1f   : > { %s36_s13 = sadd.s32 1, %s1975_s26  ;;  %s39_s7 = sadd.s32 1, %s1979_s27 }
  0x20   : > { %s242_s11 = scalar_lea.hbm %s2541_s1, %s1483_s8  ;;  %s1986_s8 = smov 128  }
  0x21   : > { %s243_s12 = sshll.u32 %s242_s11, 4  ;;  %p2110_p8 = pnand %p1321_p6, %p294_p7  ;;  %s244_s12 = int_to_ptr.hbm [resolvable:$true] %s243_s12 }
  0x22   : > { %1577 = dma.hbm_to_vmem [thread:$0]  (!%p2099_p5), %s244_s12, 2048, %s246_s14, %s2104_s16, %s1985_s17, %s1986_s8, %s1987_s9  }
  0x23   : > { %s1309_s11 = sadd.s32 4294967294, %s1983_s28   ;;  %p37_p9 = scmp.ge.s32.totalorder %s36_s13, 2 }
  0x24   : > { %s46_s12 = sadd.s32 1, %s1963_s23  ;;  %p53_p10 = scmp.ne.s32.totalorder %s1963_s23, %s1959_s22 }
  0x25   : > { %p59_p11 = scmp.ne.s32.totalorder %s1959_s22, %s1955_s21  ;;  %s2579_s13 = smov (%p37_p9, %s36_s13), 0 }
  0x26   : > { %2544 = sst [smem:[#allocation22_spill]] %s2579_s13  ;;  %s2581_s7 = smov (!%p37_p9, %s39_s7), %s1979_s27 }
  0x27   : > { %p2133_p12 = por %p54_p0, %p53_p10  ;;  %p60_p13 = scmp.eq.s32.totalorder %s2115_s30, 0 }
  0x28   : > { %p41_p1 = scmp.ge.s32.totalorder %s2581_s7, 2  ;;  %s69_s17 = ssub.s32 %s1975_s26, %s2579_s13 }
  0x29   : > { %p2143_p4 = por %p60_p13, %p59_p11  ;;  %p70_p6 = scmp.eq.s32.totalorder %s69_s17, 0 }
  0x2a   : > { %s2583_s7 = smov (%p41_p1, %s2581_s7), 0  ;;  %p2159_p0 = por %p85_p2, %p60_p13 }
  0x2b   : > { %2547 = sst [smem:[#allocation23_spill]] %s2583_s7  ;;  %s43_s1 = ssub.s32 %s1979_s27, %s2583_s7 }
  0x2c   : > { %s2152_s9 = scalar_select %p70_p6, %s1951_s20, %s72_s29  }
  0x2d   : > { %p44_p7 = scmp.eq.s32.totalorder %s43_s1, 0  ;;  %p182_p9 = scmp.eq.s32.totalorder %s2115_s30, 3 }
  0x2e   : > { %2548 = sst [smem:[#allocation24_spill]] %s2152_s9  ;;  %p188_p3 = scmp.eq.s32.totalorder %s1309_s11, 3 }
  0x2f   : > { %s211_s13 = sand.u32 1, %s1963_s23   ;;  %p2171_p1 = por %p182_p9, %p53_p10 }
  0x30   : > { %s2166_s25 = scalar_select %p44_p7, %s1963_s23, %s46_s12  }
  0x31   : > { %s2551_s17 = scalar_select %p2171_p1, 1, 0 }
  0x32   : > { %2550 = sst [smem:[#allocation25_spill]] %s2166_s25  ;;  %p2178_p6 = por %p188_p3, %p59_p11 }
  0x33   : > { %2552 = sst [smem:[#allocation26_spill]] %s2551_s17  ;;  %s1559_s29 = smul.u32 48, %s211_s13 }
  0x34   : > { %s2553_s18 = scalar_select %p2178_p6, 1, 0 }
  0x35   : > { %s1482_s7 = smul.u32 48, %s1979_s27  ;;  %p2555_p2 = scmp.lt.s32.totalorder %s1983_s28, 4 }
  0x36   : > { %2554 = sst [smem:[#allocation27_spill]] %s2553_s18  ;;  %s215_s25 = scalar_lea.vmem [#allocation3], %s1559_s29 }
  0x37   : > { %p1572_p13 = pnand %p2555_p2, %p2133_p12  ;;  %s2556_s0 = sld [smem:[#allocation28_spill]] }
  0x38   : > { %s223_s23 = sshll.u32 %s215_s25, 4  ;;  %s1316_s20 = sshll.u32 %s2088_s6, 1  ;;  %s224_s23 = int_to_ptr.vmem [resolvable:$true] %s223_s23 }
  0x39   : > { %s212_s18 = scalar_lea.sflag [#allocation4], %s211_s13  ;;  %s1988_s21 = smov 64  }
  0x3a   : > { %s1989_s27 = smov 4   ;;  %s1317_s14 = sshll.u32 %s1975_s26, 1 }
  0x3b   : > { %s259_s25 = scalar_lea.vmem [#allocation8], %s1316_s20  ;;  %s1484_s11 = sshll.u32 %s1975_s26, 7 }
  0x3c   : > { %s267_s29 = sshll.u32 %s259_s25, 4  ;;  %s275_s28 = scalar_lea.sflag [#allocation10], %s2088_s6  ;;  %s268_s29 = int_to_ptr.vmem [resolvable:$true] %s267_s29 }
  0x3d   : > { %s220_s12 = scalar_lea.hbm %s2556_s0, %s1482_s7  ;;  %s263_s7 = scalar_lea.hbm %s2513_s2, %s1317_s14 }
  0x3e   : > { %s221_s9 = sshll.u32 %s220_s12, 4  ;;  %s265_s1 = sshll.u32 %s263_s7, 4  ;;  %s222_s9 = int_to_ptr.hbm [resolvable:$true] %s221_s9  ;;  %s266_s1 = int_to_ptr.hbm [resolvable:$true] %s265_s1 }
  0x3f   : > { %1574 = dma.hbm_to_vmem [thread:$0]  (!%p1572_p13), %s222_s9, 768, %s224_s23, %s212_s18, %s1988_s21, %s1988_s21, %s1989_s27  }
  0x40   : > { %1580 = dma.hbm_to_vmem [thread:$0]  (!%p2099_p5), %s266_s1, 32, %s268_s29, %s2104_s16  }
  0x41   : > { %s283_s0 = scalar_lea.hbm %s2514_s3, %s1484_s11  ;;  %s2557_s23 = sshll.u32 %s2088_s6, 7 }
  0x42   : > { %s278_s9 = scalar_lea.vmem [#allocation9], %s2557_s23  ;;  %s284_s4 = sshll.u32 %s283_s0, 4  ;;  %s285_s4 = int_to_ptr.hbm [resolvable:$true] %s284_s4 }
  0x43   : > { %s286_s18 = sshll.u32 %s278_s9, 4  ;;  %298 = sbr.rel (%p2110_p8) target bundleno = 557 (0x22d), region = 40  ;;  %s287_s18 = int_to_ptr.vmem [resolvable:$true] %s286_s18 }
  0x44   : > { %1583 = dma.hbm_to_vmem [thread:$0]  (!%p2099_p5), %s285_s4, 2048, %s287_s18, %s275_s28, %s1988_s21, %s1988_s21, %s1989_s27  }
  0x45   : > { %s2210_s20 = sand.u32 (!%p2110_p8), 1, %s1959_s22  }
  0x46   : > { %s1560_s16 = smul.u32 (!%p2110_p8), 48, %s2210_s20  ;;  %s301_s17 = scalar_lea.sflag (!%p2110_p8), [#allocation4], %s2210_s20 }
  0x48   : > { %s2214_s14 = scalar_lea.vmem [#allocation3], %s1560_s16 }
  0x49   : > { %1926 = dma.done.wait (%p2143_p4), %s301_s17, 768  }
  0x4a   : > { %1928 = vsyncadd (%p2143_p4), %s301_s17, 4294966528  ;;  %s310_s0 = sand.u32 1, %s2115_s30   ;;  %s312_s4 = sand.u32 1, %s1947_s19  }
  0x4b   : > { %s1322_s21 = sshll.u32 %s312_s4, 7  ;;  %s311_s27 = scalar_lea.sflag [#allocation7], %s310_s0 }
  0x4c   : > { %s2222_s6 = scalar_lea.vmem [#allocation6], %s1322_s21 }
  0x4d   : > { %1930 = dma.done.wait (%p2159_p0), %s311_s27, 2080  }
  0x4e   : > { %1932 = vsyncadd (%p2159_p0), %s311_s27, 4294965216  ;;  %s1323_s15 = sshll.u32 %s312_s4, 1  ;;  %s331_s8 = scalar_lea.sflag [#allocation10], %s312_s4 }
  0x4f   : > { %s2228_s10 = scalar_lea.vmem [#allocation8], %s1323_s15  ;;  %s2230_s7 = scalar_lea.vmem [#allocation9], %s1322_s21 }
  0x50   : > { %1934 = dma.done.wait (%p2159_p0), %s331_s8, 2048  }
  0x51   : > { %1936 = vsyncadd (%p2159_p0), %s331_s8, 4294965248  ;;  %s2236_s30 = scalar_lea.vmem [#allocation11], %s1560_s16  ;;  %p1325_p3 = scmp.ne.s32.totalorder %s1967_s24, 0 }
  0x52   : > { %s2558_s1 = sld [smem:[#allocation30_spill]] (!%p1325_p3) }
  0x53   : > { %385 = sbr.rel (%p1325_p3) target bundleno = 105 (0x69), region = 60 }
  0x58   : > { %v386_v0 = vld [vmem:[%s2558_s1] sm:$0x1] }
  0x59   : > { %v387_v1 = vunpack.c.l.bf16 %v386_v0 }
  0x5b   : > { %v388_v2 = vperm.slane %v387_v1, 0 }
  0x5d   : > { %389 = vst [vmem:[#allocation2 + $0x30] sm:$0xff] %v388_v2 }
  0x5e   : > { %390 = vst [vmem:[#allocation2] sm:$0xff] %v388_v2 }
  0x5f   : > { %391 = vst [vmem:[#allocation2 + $0x58] sm:$0xff] %v388_v2 }
  0x60   : > { %392 = vst [vmem:[#allocation2 + $0x18] sm:$0xff] %v388_v2 }
  0x61   : > { %393 = vst [vmem:[#allocation2 + $0x50] sm:$0xff] %v388_v2 }
  0x62   : > { %394 = vst [vmem:[#allocation2 + $0x20] sm:$0xff] %v388_v2 }
  0x63   : > { %395 = vst [vmem:[#allocation2 + $0x8] sm:$0xff] %v388_v2 }
  0x64   : > { %396 = vst [vmem:[#allocation2 + $0x38] sm:$0xff] %v388_v2 }
  0x65   : > { %397 = vst [vmem:[#allocation2 + $0x28] sm:$0xff] %v388_v2 }
  0x66   : > { %398 = vst [vmem:[#allocation2 + $0x48] sm:$0xff] %v388_v2 }
  0x67   : > { %399 = vst [vmem:[#allocation2 + $0x10] sm:$0xff] %v388_v2 }
  0x68   : > { %400 = vst [vmem:[#allocation2 + $0x40] sm:$0xff] %v388_v2 }
  0x69 PF: > { %v1408_v3 = vld [vmem:[%s2222_s6 + $0x70] sm:$0xf]  ;;  %v1506_v4 = vld [vmem:[%s2222_s6 + $0x74] sm:$0xf0]  ;;  %v1505_v5 = vld [vmem:[%s2222_s6 + $0x74] sm:$0xf] }
  0x6a   : > { %v1409_v6 = vor.u32 %v1506_v4, %v1408_v3  ;;  %v1410_v7 = vld [vmem:[%s2222_s6 + $0x78] sm:$0xf0]  ;;  %v1400_v8 = vld [vmem:[%s2222_s6 + $0x60] sm:$0xf]  ;;  %v1504_v9 = vld [vmem:[%s2222_s6 + $0x64] sm:$0xf0] }
  0x6b   : > { %v1413_v10 = vor.u32 %v1505_v5, %v1410_v7  ;;  %v1503_v11 = vld [vmem:[%s2222_s6 + $0x64] sm:$0xf]  ;;  %v1402_v12 = vld [vmem:[%s2222_s6 + $0x68] sm:$0xf0]  ;;  %v1401_v13 = vor.u32 %v1504_v9, %v1400_v8  ;;  %v1392_v15 = vld [vmem:[%s2222_s6 + $0x50] sm:$0xf] }
  0x6c   : > { %554 = vmatpush.bf16.msra.mxu0 %v1409_v6  ;;  %v1405_v14 = vor.u32 %v1503_v11, %v1402_v12  ;;  %v1502_v16 = vld [vmem:[%s2222_s6 + $0x54] sm:$0xf0]  ;;  %v1501_v17 = vld [vmem:[%s2222_s6 + $0x54] sm:$0xf]  ;;  %v1394_v18 = vld [vmem:[%s2222_s6 + $0x58] sm:$0xf0] }
  0x6d   : > { %593 = vmatpush.bf16.msra.mxu1 %v1413_v10  ;;  %v1393_v19 = vor.u32 %v1502_v16, %v1392_v15  ;;  %v1397_v20 = vor.u32 %v1501_v17, %v1394_v18  ;;  %v1384_v21 = vld [vmem:[%s2222_s6 + $0x40] sm:$0xf]  ;;  %v1500_v22 = vld [vmem:[%s2222_s6 + $0x44] sm:$0xf0]  ;;  %v1499_v23 = vld [vmem:[%s2222_s6 + $0x44] sm:$0xf] }
  0x6e   : > { %v1386_v24 = vld [vmem:[%s2222_s6 + $0x48] sm:$0xf0]  ;;  %v1385_v25 = vor.u32 %v1500_v22, %v1384_v21  ;;  %v1376_v27 = vld [vmem:[%s2222_s6 + $0x30] sm:$0xf]  ;;  %v1498_v28 = vld [vmem:[%s2222_s6 + $0x34] sm:$0xf0] }
  0x6f   : > { %v1389_v26 = vor.u32 %v1499_v23, %v1386_v24  ;;  %v1497_v29 = vld [vmem:[%s2222_s6 + $0x34] sm:$0xf]  ;;  %v1378_v30 = vld [vmem:[%s2222_s6 + $0x38] sm:$0xf0]  ;;  %v1377_v31 = vor.u32 %v1498_v28, %v1376_v27  ;;  %v1368_v33 = vld [vmem:[%s2222_s6 + $0x20] sm:$0xf] }
  0x70   : > { %555 = vmatpush.bf16.msra.mxu0 %v1401_v13  ;;  %v1381_v32 = vor.u32 %v1497_v29, %v1378_v30  ;;  %v1496_v34 = vld [vmem:[%s2222_s6 + $0x24] sm:$0xf0]  ;;  %v1495_v35 = vld [vmem:[%s2222_s6 + $0x24] sm:$0xf]  ;;  %v1370_v36 = vld [vmem:[%s2222_s6 + $0x28] sm:$0xf0] }
  0x71   : > { %594 = vmatpush.bf16.msra.mxu1 %v1405_v14  ;;  %v1369_v37 = vor.u32 %v1496_v34, %v1368_v33  ;;  %v1373_v38 = vor.u32 %v1495_v35, %v1370_v36  ;;  %v1360_v39 = vld [vmem:[%s2222_s6 + $0x10] sm:$0xf]  ;;  %v1494_v40 = vld [vmem:[%s2222_s6 + $0x14] sm:$0xf0]  ;;  %v1493_v41 = vld [vmem:[%s2222_s6 + $0x14] sm:$0xf] }
  0x72   : > { %v1362_v42 = vld [vmem:[%s2222_s6 + $0x18] sm:$0xf0]  ;;  %v1361_v43 = vor.u32 %v1494_v40, %v1360_v39  ;;  %v1352_v45 = vld [vmem:[%s2222_s6] sm:$0xf]  ;;  %v1492_v46 = vld [vmem:[%s2222_s6 + $0x4] sm:$0xf0] }
  0x73   : > { %v1365_v44 = vor.u32 %v1493_v41, %v1362_v42  ;;  %v1491_v47 = vld [vmem:[%s2222_s6 + $0x4] sm:$0xf]  ;;  %v1354_v48 = vld [vmem:[%s2222_s6 + $0x8] sm:$0xf0]  ;;  %v1353_v49 = vor.u32 %v1492_v46, %v1352_v45  ;;  %v1514_v57 = vld [vmem:[%s2230_s7 + $0x38] sm:$0xff]  ;;  %p1478_p5 = scmp.ne.s32.totalorder %s1967_s24, 1 }
  0x74   : > { %556 = vmatpush.bf16.msra.mxu0 %v1393_v19  ;;  %v1357_v50 = vor.u32 %v1491_v47, %v1354_v48  ;;  %v1485_v51 = vld [vmem:[%s2214_s14] sm:$0xff]  ;;  %v1486_v52 = vld [vmem:[%s2214_s14 + $0x8] sm:$0xff]  ;;  %v1487_v53 = vld [vmem:[%s2214_s14 + $0x10] sm:$0xff]  ;;  %1000 = vmatpush.bf16.msra.mxu2 %v1514_v57 }
  0x75   : > { %595 = vmatpush.bf16.msra.mxu1 %v1397_v20  ;;  %v1488_v54 = vld [vmem:[%s2214_s14 + $0x18] sm:$0xff]  ;;  %v1489_v55 = vld [vmem:[%s2214_s14 + $0x20] sm:$0xff]  ;;  %v1490_v56 = vld [vmem:[%s2214_s14 + $0x28] sm:$0xff] }
  0x76   : > { %v1522_v58 = vld [vmem:[%s2230_s7 + $0x78] sm:$0xff]  ;;  %v1513_v59 = vld [vmem:[%s2230_s7 + $0x30] sm:$0xff]  ;;  %v1512_v61 = vld [vmem:[%s2230_s7 + $0x28] sm:$0xff] }
  0x77   : > { %1039 = vmatpush.bf16.msra.mxu3 %v1522_v58  ;;  %v1521_v60 = vld [vmem:[%s2230_s7 + $0x70] sm:$0xff]  ;;  %v1520_v62 = vld [vmem:[%s2230_s7 + $0x68] sm:$0xff]  ;;  %v1511_v63 = vld [vmem:[%s2230_s7 + $0x20] sm:$0xff] }
  0x78   : > { %557 = vmatpush.bf16.msra.mxu0 %v1385_v25  ;;  %1001 = vmatpush.bf16.msra.mxu2 %v1513_v59  ;;  %v1519_v0 = vld [vmem:[%s2230_s7 + $0x60] sm:$0xff]  ;;  %v429_v1 = vld [vmem:[%s2228_s10] sm:$0x3]  ;;  %v1509_v4 = vld [vmem:[%s2230_s7 + $0x10] sm:$0xff] }
  0x79   : > { %596 = vmatpush.bf16.msra.mxu1 %v1389_v26  ;;  %v1510_v2 = vld [vmem:[%s2230_s7 + $0x18] sm:$0xff]  ;;  %v1517_v5 = vld [vmem:[%s2230_s7 + $0x50] sm:$0xff]  ;;  %v430_v6 = vunpack.c.l.bf16 %v429_v1  ;;  %v1508_v9 = vld [vmem:[%s2230_s7 + $0x8] sm:$0xff] }
  0x7a   : > { %v1518_v3 = vld [vmem:[%s2230_s7 + $0x58] sm:$0xff]  ;;  %v1516_v10 = vld [vmem:[%s2230_s7 + $0x48] sm:$0xff]  ;;  %v1507_v11 = vld [vmem:[%s2230_s7] sm:$0xff] }
  0x7b   : > { %1040 = vmatpush.bf16.msra.mxu3 %v1521_v60  ;;  %v432_v7 = vperm.slane %v430_v6, 0  ;;  %v433_v8 = vperm.slane %v430_v6, 2  ;;  %v1515_v12 = vld [vmem:[%s2230_s7 + $0x40] sm:$0xff] }
  0x7c   : > { %558 = vmatpush.bf16.msra.mxu0 %v1377_v31  ;;  %1002 = vmatpush.bf16.msra.mxu2 %v1512_v61 }
  0x7d   : > { %597 = vmatpush.bf16.msra.mxu1 %v1381_v32  ;;  %v2297_v13 = vperm.slane %v432_v7, 0  ;;  %v2299_v14 = vperm.slane %v433_v8, 0 }
  0x7f   : > { %1041 = vmatpush.bf16.msra.mxu3 %v1520_v62 }
  0x80   : > { %559 = vmatpush.bf16.msra.mxu0 %v1369_v37  ;;  %1003 = vmatpush.bf16.msra.mxu2 %v1511_v63 }
  0x81   : > { %598 = vmatpush.bf16.msra.mxu1 %v1373_v38 }
  0x83   : > { %1042 = vmatpush.bf16.msra.mxu3 %v1519_v0 }
  0x84   : > { %560 = vmatpush.bf16.msra.mxu0 %v1361_v43  ;;  %1004 = vmatpush.bf16.msra.mxu2 %v1510_v2 }
  0x85   : > { %599 = vmatpush.bf16.msra.mxu1 %v1365_v44 }
  0x87   : > { %1043 = vmatpush.bf16.msra.mxu3 %v1518_v3 }
  0x88   : > { %561 = vmatpush.bf16.msra.mxu0 %v1353_v49  ;;  %1005 = vmatpush.bf16.msra.mxu2 %v1509_v4 }
  0x89   : > { %600 = vmatpush.bf16.msra.mxu1 %v1357_v50 }
  0x8b   : > { %562 = vmatmul.bf16.vlgmr.msra.gmra.mxu0 %v1485_v51  ;;  %1044 = vmatpush.bf16.msra.mxu3 %v1517_v5 }
  0x8c   : > { %601 = vmatmul.bf16.vlgmr.msra.gmra.mxu1 %v1485_v51  ;;  %1006 = vmatpush.bf16.msra.mxu2 %v1508_v9 }
  0x8f   : > { %1045 = vmatpush.bf16.msra.mxu3 %v1516_v10 }
  0x90   : > { %1007 = vmatpush.bf16.msra.mxu2 %v1507_v11 }
  0x93   : > { %1046 = vmatpush.bf16.msra.mxu3 %v1515_v12 }
  0x9b   : > { %567 = vmatmul.bf16.gmra.mxu0 %v1486_v52 }
  0x9c   : > { %606 = vmatmul.bf16.gmra.mxu1 %v1486_v52 }
  0xab   : > { %572 = vmatmul.bf16.gmra.mxu0 %v1487_v53 }
  0xac   : > { %611 = vmatmul.bf16.gmra.mxu1 %v1487_v53 }
  0xbb   : > { %577 = vmatmul.bf16.gmra.mxu0 %v1488_v54 }
  0xbc   : > { %616 = vmatmul.bf16.gmra.mxu1 %v1488_v54 }
  0xcb   : > { %582 = vmatmul.bf16.gmra.mxu0 %v1489_v55 }
  0xcc   : > { %621 = vmatmul.bf16.gmra.mxu1 %v1489_v55 }
  0xdb   : > { %587 = vmatmul.bf16.gmra.mxu0 %v1490_v56 }
  0xdc   : > { %626 = vmatmul.bf16.gmra.mxu1 %v1490_v56 }
 0x108   : > { %v563_v15 = vpop.f32.mrf.mxu0 }
 0x109   : > { %v564_v16 = vadd.f32 %v563_v15, %v2297_v13  ;;  %v602_v17 = vpop.f32.mrf.mxu1 }
 0x10a   : > { %v603_v18 = vadd.f32 %v602_v17, %v2299_v14 }
 0x10b   : > { %v656_v19 = vmul.f32 0.044715, %v564_v16  ;;  %v632_v0 = vmul.f32 0.5, %v564_v16 }
 0x10c   : > { %v657_v20 = vmul.f32 0.044715, %v603_v18  ;;  %v633_v6 = vmul.f32 0.5, %v603_v18 }
 0x10d   : > { %v680_v21 = vmul.f32 %v656_v19, %v564_v16 }
 0x10e   : > { %v681_v22 = vmul.f32 %v657_v20, %v603_v18 }
 0x10f   : > { %v704_v23 = vmul.f32 %v680_v21, %v564_v16 }
 0x110   : > { %v565_v24 = vpop.f32.mrf.mxu0  ;;  %v705_v25 = vmul.f32 %v681_v22, %v603_v18 }
 0x111   : > { %v566_v26 = vadd.f32 %v565_v24, %v2297_v13  ;;  %v604_v27 = vpop.f32.mrf.mxu1  ;;  %v728_v28 = vadd.f32 %v704_v23, %v564_v16 }
 0x112   : > { %v605_v29 = vadd.f32 %v604_v27, %v2299_v14  ;;  %v729_v30 = vadd.f32 %v705_v25, %v603_v18 }
 0x113   : > { %v658_v31 = vmul.f32 0.044715, %v566_v26  ;;  %v752_v34 = vmul.f32 0.7978846, %v728_v28  ;;  %v634_v4 = vmul.f32 0.5, %v566_v26 }
 0x114   : > { %v659_v32 = vmul.f32 0.044715, %v605_v29  ;;  %v753_v36 = vmul.f32 0.7978846, %v729_v30  ;;  %v635_v7 = vmul.f32 0.5, %v605_v29 }
 0x115   : > { %v682_v33 = vmul.f32 %v658_v31, %v566_v26  ;;  %1685 = vtanh.f32 %v752_v34 }
 0x116   : > { %v683_v35 = vmul.f32 %v659_v32, %v605_v29  ;;  %1687 = vtanh.f32 %v753_v36 }
 0x117   : > { %v706_v37 = vmul.f32 %v682_v33, %v566_v26 }
 0x118   : > { %v568_v38 = vpop.f32.mrf.mxu0  ;;  %v707_v39 = vmul.f32 %v683_v35, %v605_v29 }
 0x119   : > { %v2306_v40 = vadd.f32 %v568_v38, %v2297_v13  ;;  %v607_v41 = vpop.f32.mrf.mxu1  ;;  %v730_v42 = vadd.f32 %v706_v37, %v566_v26 }
 0x11a   : > { %v2309_v43 = vadd.f32 %v607_v41, %v2299_v14  ;;  %v731_v44 = vadd.f32 %v707_v39, %v605_v29 }
 0x11b   : > { %v660_v45 = vmul.f32 0.044715, %v2306_v40  ;;  %v754_v46 = vmul.f32 0.7978846, %v730_v42  ;;  %v1686_v51 = vpop.eup %1685 }
 0x11c   : > { %v661_v47 = vmul.f32 0.044715, %v2309_v43  ;;  %v755_v48 = vmul.f32 0.7978846, %v731_v44  ;;  %v1688_v53 = vpop.eup %1687  ;;  %v800_v60 = vadd.f32 1.0, %v1686_v51 }
 0x11d   : > { %1689 = vtanh.f32 %v754_v46  ;;  %v684_v49 = vmul.f32 %v660_v45, %v2306_v40  ;;  %v801_v1 = vadd.f32 1.0, %v1688_v53 }
 0x11e   : > { %1691 = vtanh.f32 %v755_v48  ;;  %v685_v50 = vmul.f32 %v661_v47, %v2309_v43  ;;  %v824_v11 = vmul.f32 %v800_v60, %v632_v0 }
 0x11f   : > { %v708_v52 = vmul.f32 %v684_v49, %v2306_v40  ;;  %v825_v19 = vmul.f32 %v801_v1, %v633_v6 }
 0x120   : > { %v570_v54 = vpop.f32.mrf.mxu0  ;;  %v709_v55 = vmul.f32 %v685_v50, %v2309_v43  ;;  %v636_v50 = vmul.f32 0.5, %v2306_v40 }
 0x121   : > { %v2318_v56 = vadd.f32 %v570_v54, %v2297_v13  ;;  %v609_v57 = vpop.f32.mrf.mxu1  ;;  %v732_v58 = vadd.f32 %v708_v52, %v2306_v40 }
 0x122   : > { %v2322_v59 = vadd.f32 %v609_v57, %v2299_v14  ;;  %v733_v61 = vadd.f32 %v709_v55, %v2309_v43  ;;  %v637_v57 = vmul.f32 0.5, %v2309_v43 }
 0x123   : > { %v1690_v62 = vpop.eup %1689  ;;  %v662_v63 = vmul.f32 0.044715, %v2318_v56  ;;  %v756_v10 = vmul.f32 0.7978846, %v732_v58  ;;  %v638_v54 = vmul.f32 0.5, %v2318_v56 }
 0x124   : > { %v1692_v2 = vpop.eup %1691  ;;  %v663_v3 = vmul.f32 0.044715, %v2322_v59  ;;  %v802_v5 = vadd.f32 1.0, %v1690_v62  ;;  %v757_v17 = vmul.f32 0.7978846, %v733_v61  ;;  %v639_v58 = vmul.f32 0.5, %v2322_v59 }
 0x125   : > { %v803_v8 = vadd.f32 1.0, %v1692_v2  ;;  %v686_v9 = vmul.f32 %v662_v63, %v2318_v56  ;;  %1693 = vtanh.f32 %v756_v10 }
 0x126   : > { %v826_v12 = vmul.f32 %v802_v5, %v634_v4  ;;  %v687_v15 = vmul.f32 %v663_v3, %v2322_v59  ;;  %1695 = vtanh.f32 %v757_v17 }
 0x127   : > { %v827_v20 = vmul.f32 %v803_v8, %v635_v7  ;;  %v710_v16 = vmul.f32 %v686_v9, %v2318_v56 }
 0x128   : > { %v573_v21 = vpop.f32.mrf.mxu0  ;;  %v860_v22 = vpack.c.bf16 %v826_v12, %v824_v11  ;;  %v711_v23 = vmul.f32 %v687_v15, %v2322_v59 }
 0x129   : > { %v2332_v18 = vadd.f32 %v573_v21, %v2297_v13  ;;  %v612_v24 = vpop.f32.mrf.mxu1  ;;  %v861_v25 = vpack.c.bf16 %v827_v20, %v825_v19  ;;  %v734_v26 = vadd.f32 %v710_v16, %v2318_v56 }
 0x12a   : > { %v2336_v27 = vadd.f32 %v612_v24, %v2299_v14  ;;  %1008 = vmatmul.bf16.vlgmr.msra.gmra.mxu2 %v860_v22  ;;  %v735_v28 = vadd.f32 %v711_v23, %v2322_v59 }
 0x12b   : > { %v664_v29 = vmul.f32 0.044715, %v2332_v18  ;;  %1047 = vmatmul.bf16.vlgmr.msra.gmra.mxu3 %v861_v25  ;;  %v758_v30 = vmul.f32 0.7978846, %v734_v26  ;;  %v1694_v35 = vpop.eup %1693 }
 0x12c   : > { %v665_v31 = vmul.f32 0.044715, %v2336_v27  ;;  %v759_v32 = vmul.f32 0.7978846, %v735_v28  ;;  %v1696_v37 = vpop.eup %1695  ;;  %v804_v46 = vadd.f32 1.0, %v1694_v35 }
 0x12d   : > { %1697 = vtanh.f32 %v758_v30  ;;  %v688_v33 = vmul.f32 %v664_v29, %v2332_v18  ;;  %v805_v51 = vadd.f32 1.0, %v1696_v37 }
 0x12e   : > { %1699 = vtanh.f32 %v759_v32  ;;  %v689_v34 = vmul.f32 %v665_v31, %v2336_v27  ;;  %v828_v63 = vmul.f32 %v804_v46, %v636_v50 }
 0x12f   : > { %v712_v36 = vmul.f32 %v688_v33, %v2332_v18  ;;  %v829_v2 = vmul.f32 %v805_v51, %v637_v57 }
 0x130   : > { %v575_v38 = vpop.f32.mrf.mxu0  ;;  %v713_v39 = vmul.f32 %v689_v34, %v2336_v27  ;;  %v640_v34 = vmul.f32 0.5, %v2332_v18 }
 0x131   : > { %v2346_v41 = vadd.f32 %v575_v38, %v2297_v13  ;;  %v614_v42 = vpop.f32.mrf.mxu1  ;;  %v736_v44 = vadd.f32 %v712_v36, %v2332_v18 }
 0x132   : > { %v2350_v45 = vadd.f32 %v614_v42, %v2299_v14  ;;  %v737_v47 = vadd.f32 %v713_v39, %v2336_v27  ;;  %v641_v42 = vmul.f32 0.5, %v2336_v27 }
 0x133   : > { %v1698_v48 = vpop.eup %1697  ;;  %v666_v49 = vmul.f32 0.044715, %v2346_v41  ;;  %v760_v62 = vmul.f32 0.7978846, %v736_v44  ;;  %v642_v38 = vmul.f32 0.5, %v2346_v41 }
 0x134   : > { %v1700_v52 = vpop.eup %1699  ;;  %v667_v53 = vmul.f32 0.044715, %v2350_v45  ;;  %v806_v55 = vadd.f32 1.0, %v1698_v48  ;;  %v761_v40 = vmul.f32 0.7978846, %v737_v47  ;;  %v643_v44 = vmul.f32 0.5, %v2350_v45 }
 0x135   : > { %v807_v60 = vadd.f32 1.0, %v1700_v52  ;;  %v690_v61 = vmul.f32 %v666_v49, %v2346_v41  ;;  %1701 = vtanh.f32 %v760_v62 }
 0x136   : > { %v830_v0 = vmul.f32 %v806_v55, %v638_v54  ;;  %v691_v1 = vmul.f32 %v667_v53, %v2350_v45  ;;  %1703 = vtanh.f32 %v761_v40 }
 0x137   : > { %v831_v3 = vmul.f32 %v807_v60, %v639_v58  ;;  %v714_v4 = vmul.f32 %v690_v61, %v2346_v41 }
 0x138   : > { %v578_v5 = vpop.f32.mrf.mxu0  ;;  %v862_v56 = vpack.c.bf16 %v830_v0, %v828_v63  ;;  %v715_v6 = vmul.f32 %v691_v1, %v2350_v45 }
 0x139   : > { %v2364_v43 = vadd.f32 %v578_v5, %v2297_v13  ;;  %v617_v59 = vpop.f32.mrf.mxu1  ;;  %v863_v7 = vpack.c.bf16 %v831_v3, %v829_v2  ;;  %v738_v8 = vadd.f32 %v714_v4, %v2346_v41 }
 0x13a   : > { %v2368_v9 = vadd.f32 %v617_v59, %v2299_v14  ;;  %1013 = vmatmul.bf16.gmra.mxu2 %v862_v56  ;;  %v739_v10 = vadd.f32 %v715_v6, %v2350_v45 }
 0x13b   : > { %v668_v11 = vmul.f32 0.044715, %v2364_v43  ;;  %1052 = vmatmul.bf16.gmra.mxu3 %v863_v7  ;;  %v762_v12 = vmul.f32 0.7978846, %v738_v8  ;;  %v1702_v16 = vpop.eup %1701 }
 0x13c   : > { %v669_v15 = vmul.f32 0.044715, %v2368_v9  ;;  %v763_v17 = vmul.f32 0.7978846, %v739_v10  ;;  %v1704_v22 = vpop.eup %1703  ;;  %v808_v30 = vadd.f32 1.0, %v1702_v16 }
 0x13d   : > { %1705 = vtanh.f32 %v762_v12  ;;  %v692_v19 = vmul.f32 %v668_v11, %v2364_v43  ;;  %v809_v35 = vadd.f32 1.0, %v1704_v22 }
 0x13e   : > { %1707 = vtanh.f32 %v763_v17  ;;  %v693_v20 = vmul.f32 %v669_v15, %v2368_v9  ;;  %v832_v49 = vmul.f32 %v808_v30, %v640_v34 }
 0x13f   : > { %v716_v21 = vmul.f32 %v692_v19, %v2364_v43  ;;  %v833_v52 = vmul.f32 %v809_v35, %v641_v42 }
 0x140   : > { %v580_v23 = vpop.f32.mrf.mxu0  ;;  %v717_v24 = vmul.f32 %v693_v20, %v2368_v9  ;;  %v644_v20 = vmul.f32 0.5, %v2364_v43 }
 0x141   : > { %v2378_v25 = vadd.f32 %v580_v23, %v2297_v13  ;;  %v619_v26 = vpop.f32.mrf.mxu1  ;;  %v740_v28 = vadd.f32 %v716_v21, %v2364_v43 }
 0x142   : > { %v2382_v29 = vadd.f32 %v619_v26, %v2299_v14  ;;  %v741_v31 = vadd.f32 %v717_v24, %v2368_v9  ;;  %v645_v26 = vmul.f32 0.5, %v2368_v9 }
 0x143   : > { %v1706_v32 = vpop.eup %1705  ;;  %v670_v33 = vmul.f32 0.044715, %v2378_v25  ;;  %v764_v48 = vmul.f32 0.7978846, %v740_v28  ;;  %v646_v23 = vmul.f32 0.5, %v2378_v25 }
 0x144   : > { %v1708_v36 = vpop.eup %1707  ;;  %v671_v37 = vmul.f32 0.044715, %v2382_v29  ;;  %v810_v39 = vadd.f32 1.0, %v1706_v32  ;;  %v765_v18 = vmul.f32 0.7978846, %v741_v31  ;;  %v647_v28 = vmul.f32 0.5, %v2382_v29 }
 0x145   : > { %v811_v46 = vadd.f32 1.0, %v1708_v36  ;;  %v694_v47 = vmul.f32 %v670_v33, %v2378_v25  ;;  %1709 = vtanh.f32 %v764_v48 }
 0x146   : > { %v834_v50 = vmul.f32 %v810_v39, %v642_v38  ;;  %v695_v51 = vmul.f32 %v671_v37, %v2382_v29  ;;  %1711 = vtanh.f32 %v765_v18 }
 0x147   : > { %v835_v53 = vmul.f32 %v811_v46, %v643_v44  ;;  %v718_v54 = vmul.f32 %v694_v47, %v2378_v25 }
 0x148   : > { %v583_v55 = vpop.f32.mrf.mxu0  ;;  %v864_v41 = vpack.c.bf16 %v834_v50, %v832_v49  ;;  %v719_v57 = vmul.f32 %v695_v51, %v2382_v29 }
 0x149   : > { %v2396_v27 = vadd.f32 %v583_v55, %v2297_v13  ;;  %v622_v45 = vpop.f32.mrf.mxu1  ;;  %v865_v58 = vpack.c.bf16 %v835_v53, %v833_v52  ;;  %v742_v60 = vadd.f32 %v718_v54, %v2378_v25 }
 0x14a   : > { %v2400_v61 = vadd.f32 %v622_v45, %v2299_v14  ;;  %1018 = vmatmul.bf16.gmra.mxu2 %v864_v41  ;;  %v743_v62 = vadd.f32 %v719_v57, %v2382_v29 }
 0x14b   : > { %v672_v63 = vmul.f32 0.044715, %v2396_v27  ;;  %1057 = vmatmul.bf16.gmra.mxu3 %v865_v58  ;;  %v766_v0 = vmul.f32 0.7978846, %v742_v60  ;;  %v1710_v4 = vpop.eup %1709 }
 0x14c   : > { %v673_v1 = vmul.f32 0.044715, %v2400_v61  ;;  %v767_v40 = vmul.f32 0.7978846, %v743_v62  ;;  %v1712_v56 = vpop.eup %1711  ;;  %v812_v12 = vadd.f32 1.0, %v1710_v4 }
 0x14d   : > { %1713 = vtanh.f32 %v766_v0  ;;  %v696_v2 = vmul.f32 %v672_v63, %v2396_v27  ;;  %v813_v16 = vadd.f32 1.0, %v1712_v56 }
 0x14e   : > { %1715 = vtanh.f32 %v767_v40  ;;  %v697_v3 = vmul.f32 %v673_v1, %v2400_v61  ;;  %v836_v33 = vmul.f32 %v812_v12, %v644_v20 }
 0x14f   : > { %v720_v5 = vmul.f32 %v696_v2, %v2396_v27  ;;  %v837_v36 = vmul.f32 %v813_v16, %v645_v26 }
 0x150   : > { %v585_v6 = vpop.f32.mrf.mxu0  ;;  %v721_v59 = vmul.f32 %v697_v3, %v2400_v61  ;;  %v648_v3 = vmul.f32 0.5, %v2396_v27 }
 0x151   : > { %v2410_v7 = vadd.f32 %v585_v6, %v2297_v13  ;;  %v624_v8 = vpop.f32.mrf.mxu1  ;;  %v744_v10 = vadd.f32 %v720_v5, %v2396_v27 }
 0x152   : > { %v2414_v11 = vadd.f32 %v624_v8, %v2299_v14  ;;  %v745_v15 = vadd.f32 %v721_v59, %v2400_v61 }
 0x153   : > { %v1714_v17 = vpop.eup %1713  ;;  %v674_v19 = vmul.f32 0.044715, %v2410_v7  ;;  %v768_v32 = vmul.f32 0.7978846, %v744_v10  ;;  %v650_v6 = vmul.f32 0.5, %v2410_v7 }
 0x154   : > { %v1716_v21 = vpop.eup %1715  ;;  %v675_v22 = vmul.f32 0.044715, %v2414_v11  ;;  %v814_v24 = vadd.f32 1.0, %v1714_v17  ;;  %v769_v43 = vmul.f32 0.7978846, %v745_v15  ;;  %v651_v8 = vmul.f32 0.5, %v2414_v11 }
 0x155   : > { %v815_v30 = vadd.f32 1.0, %v1716_v21  ;;  %v698_v31 = vmul.f32 %v674_v19, %v2410_v7  ;;  %1717 = vtanh.f32 %v768_v32 }
 0x156   : > { %v838_v34 = vmul.f32 %v814_v24, %v646_v23  ;;  %v699_v35 = vmul.f32 %v675_v22, %v2414_v11  ;;  %1719 = vtanh.f32 %v769_v43 }
 0x157   : > { %v839_v37 = vmul.f32 %v815_v30, %v647_v28  ;;  %v722_v38 = vmul.f32 %v698_v31, %v2410_v7 }
 0x158   : > { %v588_v39 = vpop.f32.mrf.mxu0  ;;  %v866_v25 = vpack.c.bf16 %v838_v34, %v836_v33  ;;  %v723_v42 = vmul.f32 %v699_v35, %v2414_v11 }
 0x159   : > { %v2428_v9 = vadd.f32 %v588_v39, %v2297_v13  ;;  %v627_v29 = vpop.f32.mrf.mxu1  ;;  %v867_v44 = vpack.c.bf16 %v839_v37, %v837_v36  ;;  %v746_v46 = vadd.f32 %v722_v38, %v2410_v7 }
 0x15a   : > { %v2432_v47 = vadd.f32 %v627_v29, %v2299_v14  ;;  %1023 = vmatmul.bf16.gmra.mxu2 %v866_v25  ;;  %v747_v48 = vadd.f32 %v723_v42, %v2414_v11 }
 0x15b   : > { %v676_v49 = vmul.f32 0.044715, %v2428_v9  ;;  %1062 = vmatmul.bf16.gmra.mxu3 %v867_v44  ;;  %v770_v50 = vmul.f32 0.7978846, %v746_v46  ;;  %v1718_v54 = vpop.eup %1717  ;;  %v652_v35 = vmul.f32 0.5, %v2428_v9 }
 0x15c   : > { %v677_v51 = vmul.f32 0.044715, %v2432_v47  ;;  %v771_v18 = vmul.f32 0.7978846, %v747_v48  ;;  %v1720_v41 = vpop.eup %1719  ;;  %v816_v0 = vadd.f32 1.0, %v1718_v54  ;;  %v653_v37 = vmul.f32 0.5, %v2432_v47 }
 0x15d   : > { %1721 = vtanh.f32 %v770_v50  ;;  %v700_v52 = vmul.f32 %v676_v49, %v2428_v9  ;;  %v817_v4 = vadd.f32 1.0, %v1720_v41  ;;  %v848_v50 = vld [vmem:[#allocation2 + $0x30] sm:$0xff] }
 0x15e   : > { %1723 = vtanh.f32 %v771_v18  ;;  %v701_v53 = vmul.f32 %v677_v51, %v2432_v47  ;;  %v840_v15 = vmul.f32 %v816_v0, %v648_v3  ;;  %v852_v3 = vld [vmem:[#allocation2 + $0x50] sm:$0xff] }
 0x15f   : > { %v724_v55 = vmul.f32 %v700_v52, %v2428_v9 }
 0x160   : > { %v590_v57 = vpop.f32.mrf.mxu0  ;;  %v725_v45 = vmul.f32 %v701_v53, %v2432_v47  ;;  %v849_v53 = vld [vmem:[#allocation2] sm:$0xff] }
 0x161   : > { %v591_v58 = vadd.f32 %v590_v57, %v2297_v13  ;;  %v629_v60 = vpop.f32.mrf.mxu1  ;;  %v748_v62 = vadd.f32 %v724_v55, %v2428_v9  ;;  %v649_v13 = vmul.f32 0.5, %v2400_v61  ;;  %v850_v57 = vld [vmem:[#allocation2 + $0x58] sm:$0xff] }
 0x162   : > { %v630_v63 = vadd.f32 %v629_v60, %v2299_v14  ;;  %v749_v1 = vadd.f32 %v725_v45, %v2432_v47 }
 0x163   : > { %v1722_v40 = vpop.eup %1721  ;;  %v678_v2 = vmul.f32 0.044715, %v591_v58  ;;  %v772_v14 = vmul.f32 0.7978846, %v748_v62  ;;  %v841_v16 = vmul.f32 %v817_v4, %v649_v13  ;;  %v654_v43 = vmul.f32 0.5, %v591_v58 }
 0x164   : > { %v1724_v5 = vpop.eup %1723  ;;  %v679_v56 = vmul.f32 0.044715, %v630_v63  ;;  %v818_v59 = vadd.f32 1.0, %v1722_v40  ;;  %v773_v20 = vmul.f32 0.7978846, %v749_v1  ;;  %v655_v38 = vmul.f32 0.5, %v630_v63 }
 0x165   : > { %v819_v10 = vadd.f32 1.0, %v1724_v5  ;;  %v702_v12 = vmul.f32 %v678_v2, %v591_v58  ;;  %1725 = vtanh.f32 %v772_v14  ;;  %v854_v14 = vld [vmem:[#allocation2 + $0x8] sm:$0xff] }
 0x166   : > { %v842_v17 = vmul.f32 %v818_v59, %v650_v6  ;;  %v703_v19 = vmul.f32 %v679_v56, %v630_v63  ;;  %1727 = vtanh.f32 %v773_v20  ;;  %v853_v59 = vld [vmem:[#allocation2 + $0x20] sm:$0xff] }
 0x167   : > { %v843_v21 = vmul.f32 %v819_v10, %v651_v8  ;;  %v726_v27 = vmul.f32 %v702_v12, %v591_v58 }
 0x168   : > { %v868_v22 = vpack.c.bf16 %v842_v17, %v840_v15  ;;  %v727_v23 = vmul.f32 %v703_v19, %v630_v63 }
 0x169   : > { %v869_v24 = vpack.c.bf16 %v843_v21, %v841_v16  ;;  %v750_v26 = vadd.f32 %v726_v27, %v591_v58  ;;  %v855_v16 = vld [vmem:[#allocation2 + $0x38] sm:$0xff] }
 0x16a   : > { %1028 = vmatmul.bf16.gmra.mxu2 %v868_v22  ;;  %v751_v7 = vadd.f32 %v727_v23, %v630_v63  ;;  %v851_v63 = vld [vmem:[#allocation2 + $0x18] sm:$0xff] }
 0x16b   : > { %1067 = vmatmul.bf16.gmra.mxu3 %v869_v24  ;;  %v774_v61 = vmul.f32 0.7978846, %v750_v26  ;;  %v1726_v28 = vpop.eup %1725  ;;  %v856_v24 = vld [vmem:[#allocation2 + $0x28] sm:$0xff] }
 0x16c   : > { %v775_v11 = vmul.f32 0.7978846, %v751_v7  ;;  %v1728_v30 = vpop.eup %1727  ;;  %v820_v31 = vadd.f32 1.0, %v1726_v28  ;;  %v857_v28 = vld [vmem:[#allocation2 + $0x48] sm:$0xff] }
 0x16d   : > { %1729 = vtanh.f32 %v774_v61  ;;  %v821_v33 = vadd.f32 1.0, %v1728_v30 }
 0x16e   : > { %1731 = vtanh.f32 %v775_v11  ;;  %v844_v25 = vmul.f32 %v820_v31, %v652_v35 }
 0x16f   : > { %v845_v29 = vmul.f32 %v821_v33, %v653_v37 }
 0x173   : > { %v1730_v32 = vpop.eup %1729 }
 0x174   : > { %v1732_v34 = vpop.eup %1731  ;;  %v822_v36 = vadd.f32 1.0, %v1730_v32 }
 0x175   : > { %v823_v39 = vadd.f32 1.0, %v1732_v34  ;;  %v858_v34 = vld [vmem:[#allocation2 + $0x10] sm:$0xff] }
 0x176   : > { %v846_v42 = vmul.f32 %v822_v36, %v654_v43 }
 0x177   : > { %v847_v44 = vmul.f32 %v823_v39, %v655_v38  ;;  %v859_v38 = vld [vmem:[#allocation2 + $0x40] sm:$0xff] }
 0x178   : > { %v870_v46 = vpack.c.bf16 %v846_v42, %v844_v25 }
 0x179   : > { %v871_v48 = vpack.c.bf16 %v847_v44, %v845_v29 }
 0x17a   : > { %1033 = vmatmul.bf16.gmra.mxu2 %v870_v46 }
 0x17b   : > { %1072 = vmatmul.bf16.gmra.mxu3 %v871_v48 }
 0x1ad   : > { %v1009_v49 = vpop.f32.mrf.mxu2 }
 0x1ae   : > { %v1048_v51 = vpop.f32.mrf.mxu3 }
 0x1af   : > { %v1049_v18 = vadd.f32 %v1048_v51, %v1009_v49 }
 0x1b1   : > { %v1078_v52 = vadd.f32 %v1049_v18, %v848_v50 }
 0x1b3   : > { %1090 = vst [vmem:[#allocation2 + $0x30] sm:$0xff] %v1078_v52 }
 0x1b5   : > { %v1011_v9 = vpop.f32.mrf.mxu2 }
 0x1b6   : > { %v1050_v54 = vpop.f32.mrf.mxu3 }
 0x1b7   : > { %v1051_v47 = vadd.f32 %v1050_v54, %v1011_v9 }
 0x1b9   : > { %v1079_v55 = vadd.f32 %v1051_v47, %v849_v53 }
 0x1bb   : > { %1091 = vst [vmem:[#allocation2] sm:$0xff] %v1079_v55 }
 0x1bd   : > { %v1014_v41 = vpop.f32.mrf.mxu2 }
 0x1be   : > { %v1053_v45 = vpop.f32.mrf.mxu3 }
 0x1bf   : > { %v1054_v58 = vadd.f32 %v1053_v45, %v1014_v41 }
 0x1c1   : > { %v1080_v60 = vadd.f32 %v1054_v58, %v850_v57 }
 0x1c3   : > { %1092 = vst [vmem:[#allocation2 + $0x58] sm:$0xff] %v1080_v60 }
 0x1c5   : > { %v1016_v62 = vpop.f32.mrf.mxu2 }
 0x1c6   : > { %v1055_v0 = vpop.f32.mrf.mxu3 }
 0x1c7   : > { %v1056_v1 = vadd.f32 %v1055_v0, %v1016_v62 }
 0x1c9   : > { %v1081_v40 = vadd.f32 %v1056_v1, %v851_v63 }
 0x1cb   : > { %1093 = vst [vmem:[#allocation2 + $0x18] sm:$0xff] %v1081_v40 }
 0x1cd   : > { %v1019_v2 = vpop.f32.mrf.mxu2 }
 0x1ce   : > { %v1058_v4 = vpop.f32.mrf.mxu3 }
 0x1cf   : > { %v1059_v5 = vadd.f32 %v1058_v4, %v1019_v2 }
 0x1d1   : > { %v1082_v56 = vadd.f32 %v1059_v5, %v852_v3 }
 0x1d3   : > { %1094 = vst [vmem:[#allocation2 + $0x50] sm:$0xff] %v1082_v56 }
 0x1d5   : > { %v1021_v6 = vpop.f32.mrf.mxu2 }
 0x1d6   : > { %v1060_v13 = vpop.f32.mrf.mxu3 }
 0x1d7   : > { %v1061_v8 = vadd.f32 %v1060_v13, %v1021_v6 }
 0x1d9   : > { %v1083_v10 = vadd.f32 %v1061_v8, %v853_v59 }
 0x1db   : > { %1095 = vst [vmem:[#allocation2 + $0x20] sm:$0xff] %v1083_v10 }
 0x1dd   : > { %v1024_v12 = vpop.f32.mrf.mxu2 }
 0x1de   : > { %v1063_v15 = vpop.f32.mrf.mxu3 }
 0x1df   : > { %v1064_v17 = vadd.f32 %v1063_v15, %v1024_v12 }
 0x1e1   : > { %v1084_v19 = vadd.f32 %v1064_v17, %v854_v14 }
 0x1e3   : > { %1096 = vst [vmem:[#allocation2 + $0x8] sm:$0xff] %v1084_v19 }
 0x1e5   : > { %v1026_v20 = vpop.f32.mrf.mxu2 }
 0x1e6   : > { %v1065_v21 = vpop.f32.mrf.mxu3 }
 0x1e7   : > { %v1066_v27 = vadd.f32 %v1065_v21, %v1026_v20 }
 0x1e9   : > { %v1085_v22 = vadd.f32 %v1066_v27, %v855_v16 }
 0x1eb   : > { %1097 = vst [vmem:[#allocation2 + $0x38] sm:$0xff] %v1085_v22 }
 0x1ed   : > { %v1029_v23 = vpop.f32.mrf.mxu2 }
 0x1ee   : > { %v1068_v26 = vpop.f32.mrf.mxu3 }
 0x1ef   : > { %v1069_v7 = vadd.f32 %v1068_v26, %v1029_v23 }
 0x1f1   : > { %v1086_v61 = vadd.f32 %v1069_v7, %v856_v24 }
 0x1f3   : > { %1098 = vst [vmem:[#allocation2 + $0x28] sm:$0xff] %v1086_v61 }
 0x1f5   : > { %v1031_v11 = vpop.f32.mrf.mxu2 }
 0x1f6   : > { %v1070_v30 = vpop.f32.mrf.mxu3 }
 0x1f7   : > { %v1071_v31 = vadd.f32 %v1070_v30, %v1031_v11 }
 0x1f9   : > { %v1087_v32 = vadd.f32 %v1071_v31, %v857_v28 }
 0x1fb   : > { %1099 = vst [vmem:[#allocation2 + $0x48] sm:$0xff] %v1087_v32 }
 0x1fd   : > { %v1034_v33 = vpop.f32.mrf.mxu2 }
 0x1fe   : > { %v1073_v35 = vpop.f32.mrf.mxu3 }
 0x1ff   : > { %v1074_v43 = vadd.f32 %v1073_v35, %v1034_v33 }
 0x201   : > { %v1088_v36 = vadd.f32 %v1074_v43, %v858_v34 }
 0x203   : > { %1100 = vst [vmem:[#allocation2 + $0x10] sm:$0xff] %v1088_v36 }
 0x205   : > { %v1036_v37 = vpop.f32.mrf.mxu2 }
 0x206   : > { %v1075_v39 = vpop.f32.mrf.mxu3 }
 0x207   : > { %v1076_v25 = vadd.f32 %v1075_v39, %v1036_v37  ;;  %1105 = sbr.rel (%p1478_p5) target bundleno = 534 (0x216), region = 64 }
 0x209   : > { %v1089_v42 = vadd.f32 %v1076_v25, %v859_v38 }
 0x20b   : > { %1101 = vst [vmem:[#allocation2 + $0x40] sm:$0xff] %v1089_v42 }
 0x20c   : > { %v1106_v29 = vld [vmem:[#allocation2 + $0x30] sm:$0xff]  ;;  %v1107_v44 = vld [vmem:[#allocation2] sm:$0xff]  ;;  %v1108_v46 = vld [vmem:[#allocation2 + $0x58] sm:$0xff] }
 0x20d   : > { %v1527_v48 = vpack.c.bf16 %v1107_v44, %v1106_v29  ;;  %v1109_v49 = vld [vmem:[#allocation2 + $0x18] sm:$0xff]  ;;  %v1110_v50 = vld [vmem:[#allocation2 + $0x50] sm:$0xff]  ;;  %v1111_v51 = vld [vmem:[#allocation2 + $0x20] sm:$0xff] }
 0x20e   : > { %v1532_v18 = vpack.c.bf16 %v1109_v49, %v1108_v46  ;;  %v1537_v52 = vpack.c.bf16 %v1111_v51, %v1110_v50  ;;  %v1112_v9 = vld [vmem:[#allocation2 + $0x8] sm:$0xff]  ;;  %v1113_v53 = vld [vmem:[#allocation2 + $0x38] sm:$0xff]  ;;  %v1116_v41 = vld [vmem:[#allocation2 + $0x10] sm:$0xff] }
 0x20f   : > { %v1114_v54 = vld [vmem:[#allocation2 + $0x28] sm:$0xff]  ;;  %1528 = vst [vmem:[%s2236_s30] sm:$0xff] %v1527_v48   ;;  %v1542_v47 = vpack.c.bf16 %v1113_v53, %v1112_v9 }
 0x210   : > { %v1115_v55 = vld [vmem:[#allocation2 + $0x48] sm:$0xff]  ;;  %1554 = vst [vmem:[%s2236_s30 + $0x8] sm:$0xff] %v1532_v18  }
 0x211   : > { %v1547_v45 = vpack.c.bf16 %v1115_v55, %v1114_v54  ;;  %1555 = vst [vmem:[%s2236_s30 + $0x10] sm:$0xff] %v1537_v52  }
 0x212   : > { %v1117_v57 = vld [vmem:[#allocation2 + $0x40] sm:$0xff]  ;;  %1556 = vst [vmem:[%s2236_s30 + $0x18] sm:$0xff] %v1542_v47  }
 0x213   : > { %v1552_v58 = vpack.c.bf16 %v1117_v57, %v1116_v41  ;;  %1557 = vst [vmem:[%s2236_s30 + $0x20] sm:$0xff] %v1547_v45  }
 0x215   : > { %1558 = vst [vmem:[%s2236_s30 + $0x28] sm:$0xff] %v1552_v58  }
 0x216 PF: > { %s2559_s5 = sld [smem:[#allocation19_spill]]  ;;  %s1155_s12 = sshll.u32 %s2236_s30, 4  ;;  %s1156_s12 = int_to_ptr.vmem [resolvable:$true] %s1155_s12 }
 0x217   : > { %s2561_s9 = sld [smem:[#allocation31_spill]]  ;;  %s1143_s16 = scalar_lea.sflag [#allocation5], %s2210_s20 }
 0x21c   : > { %s1523_s11 = smul.u32 48, %s2559_s5 }
 0x21d   : > { %s1873_s21 = scalar_lea.hbm %s2561_s9, 96 }
 0x21e   : > { %s1154_s18 = scalar_lea.hbm %s2561_s9, %s1523_s11 }
 0x21f   : > { %s1157_s28 = sshll.u32 %s1154_s18, 4  ;;  %s1158_s28 = int_to_ptr.hbm [resolvable:$true] %s1157_s28 }
 0x220   : > { %s1867_s17 = sshra.s32 %s1158_s28, 4  ;;  %s1868_s17 = int_to_ptr.hbm [resolvable:$true] %s1867_s17 }
 0x221   : > { %s1869_s14 = scalar_lea.hbm %s1868_s17, 48  ;;  %p1874_p12 = scmp.lt.s32.totalorder %s1868_s17, %s2561_s9 }
 0x222   : > { %p1870_p8 = scmp.ne.s32.totalorder %s1868_s17, %s1869_s14  ;;  %p1875_p4 = scmp.lt.s32.totalorder %s1873_s21, %s1869_s14 }
 0x224   : > { %p1871_p10 = pnand %p1870_p8, %p2171_p1  ;;  %p1876_p0 = por %p1875_p4, %p1874_p12 }
 0x226   : > { %p1872_p11 = pneg %p1871_p10 }
 0x228   : > { %p1877_p7 = pnand %p1876_p0, %p1872_p11 }
 0x22a   : > { %1880 = shalt.err (!%p1877_p7)
}
 0x22b   : > { %s1990_s20 = smov 64   ;;  %s1991_s15 = smov 4  }
 0x22c   : > { %1569 = dma.vmem_to_hbm [thread:$0]  (%p2171_p1), %s1156_s12, 768, %s1158_s28, %s1143_s16, %s1990_s20, %s1990_s20, %s1991_s15  }
 0x22d PF: > { %s2562_s10 = sld [smem:[#allocation21_spill]] }
 0x22e   : > { %s2563_s8 = sld [smem:[#allocation17_spill]] }
 0x233   : > { %p1589_p9 = scmp.ge.s32.totalorder %s2562_s10, 2 }
 0x234   : > { %s1172_s30 = sand.u32 1, %s2563_s8  }
 0x235   : > { %p1585_p2 = pnand %p1589_p9, %p2178_p6  ;;  %s1173_s25 = scalar_lea.sflag [#allocation5], %s1172_s30 }
 0x237   : > { %p1586_p13 = pneg %p1585_p2 }
 0x239   : > { %1938 = dma.done.wait (%p1586_p13), %s1173_s25, 768  }
 0x23a   : > { %1940 = vsyncadd (%p1586_p13), %s1173_s25, 4294966528  ;;  %s27_s28 = sadd.s32 1, %s2562_s10   ;;  %s2565_s29 = sld [smem:[#allocation16_spill]] }
 0x23b   : > { %p24_p3 = scmp.ge.s32.totalorder %s27_s28, 6   ;;  %s2566_s20 = sld [smem:[#allocation24_spill]] }
 0x23c   : > { %s2567_s1 = sld [smem:[#allocation18_spill]]  ;;  %s2572_s18 = smov %s1947_s19 }
 0x23d   : > { %s2568_s23 = sld [smem:[#allocation25_spill]]  ;;  %s2574_s21 = smov %s1959_s22 }
 0x23e   : > { %s2569_s25 = sld [smem:[#allocation20_spill]]  ;;  %s2576_s24 = smov %s1975_s26 }
 0x23f   : > { %s2570_s5 = sld [smem:[#allocation22_spill]] }
 0x240   : > { %s2571_s27 = sld [smem:[#allocation23_spill]]  ;;  %s2573_s19 = smov %s2565_s29 }
 0x241   :  { %26 = sbr.rel (!%p24_p3) target bundleno = 18 (0x12), region = 130 }
 0x242   : > { %s2575_s22 = smov %s2567_s1 }
 0x245   : > { %s2577_s26 = smov %s2570_s5 }
 0x246   :  { %1179 = vsyncpa [#allocation4], 1 }
 0x247   :  { %1181 = vsyncpa [#allocation4 + $0x1], 1 }
 0x248   :  { %1182 = vsyncpa [#allocation7], 1 }
 0x249   :  { %1184 = vsyncpa [#allocation7 + $0x1], 1 }
 0x24a   :  { %1185 = vsyncpa [#allocation10], 1 }
 0x24b   :  { %1187 = vsyncpa [#allocation10 + $0x1], 1 }
 0x24c   :  { %1188 = vsyncpa [#allocation5], 1 }
 0x24d   :  { %1190 = vsyncpa [#allocation5 + $0x1], 1 }

</bundles_post_ra>
